<compile_context>
chip_gen: v5e
topology: v5e:2x2
jax: 0.10.0
libtpu: 0.0.40
codegen_flags: <defaults>
</compile_context>

<pallas_src>
import math

import jax
import jax.numpy as jnp
from jax.experimental import pallas as pl
from jax.experimental.pallas import tpu as pltpu

HIDDEN = 128


def _round_up(x, m):
    return ((x + m - 1) // m) * m


def actor_kernel(x_ref, w1_ref, b1_ref, w2_ref, b2_ref, w3_ref, b3_ref, out_ref):
    # One batch tile per grid step: three chained MXU matmuls (bf16 operands,
    # f32 accumulate) with f32 VPU/EUP elementwise ops in between.
    x = x_ref[...].astype(jnp.bfloat16)

    h1 = jnp.dot(x, w1_ref[...], preferred_element_type=jnp.float32) + b1_ref[...]
    h1 = jnp.maximum(h1, 0.0)

    h2 = jnp.dot(h1.astype(jnp.bfloat16), w2_ref[...],
                 preferred_element_type=jnp.float32) + b2_ref[...]
    h2 = jnp.maximum(h2, 0.0)

    a = jnp.dot(h2.astype(jnp.bfloat16), w3_ref[...],
                preferred_element_type=jnp.float32) + b3_ref[...]
    out_ref[...] = jnp.tanh(a).astype(out_ref.dtype)


def actor_forward(state, params, *, block_b=256):
    """state: (B, state_dim) f32.  params: dict of w1,b1,w2,b2,w3,b3 (w* bf16, b* f32)."""
    w1, b1, w2, b2, w3, b3 = (params[k] for k in ("w1", "b1", "w2", "b2", "w3", "b3"))
    B, state_dim = state.shape
    action_dim = w3.shape[1]

    # Batch tile: multiple of 8 (sublane), capped at block_b (256 fills the
    # v6e/v7x MXU M dim; also well within v7x's 64 MiB VMEM with headroom for
    # double-buffered x/out tiles + resident weights).
    tb = min(block_b, _round_up(B, 8))
    b_pad = _round_up(B, tb)
    x = state if b_pad == B else jnp.pad(state, ((0, b_pad - B), (0, 0)))
    grid = (b_pad // tb,)

    # Weights/biases: full-array blocks, constant index_map -> resident in VMEM.
    def resident(arr):
        return pl.BlockSpec(arr.shape, lambda i: tuple(0 for _ in arr.shape))

    flops = 2 * B * (state_dim * HIDDEN + HIDDEN * HIDDEN + HIDDEN * action_dim)
    bytes_accessed = (
        x.size * 4 + b_pad * action_dim * 4
        + w1.size * 2 + w2.size * 2 + w3.size * 2
        + (b1.size + b2.size + b3.size) * 4
    )

    out = pl.pallas_call(
        actor_kernel,
        out_shape=jax.ShapeDtypeStruct((b_pad, action_dim), jnp.float32),
        grid=grid,
        in_specs=[
            pl.BlockSpec((tb, state_dim), lambda i: (i, 0)),
            resident(w1), resident(b1),
            resident(w2), resident(b2),
            resident(w3), resident(b3),
        ],
        out_specs=pl.BlockSpec((tb, action_dim), lambda i: (i, 0)),
        compiler_params=pltpu.CompilerParams(
            dimension_semantics=("parallel",),
        ),
        cost_estimate=pl.CostEstimate(
            flops=flops,
            transcendentals=B * action_dim,
            bytes_accessed=bytes_accessed,
        ),
    )(x, w1, b1, w2, b2, w3, b3)

    return out[:B] if b_pad != B else out


def init_actor_params(key, state_dim, action_dim, hidden=HIDDEN):
    """PyTorch nn.Linear default init (U(-1/sqrt(fan_in), +1/sqrt(fan_in))).

    Weights are stored in bf16 (MXU operands); biases stay f32 (f32 bias add).
    """
    keys = jax.random.split(key, 6)

    def linear(kw, kb, fan_in, fan_out):
        bound = 1.0 / math.sqrt(fan_in)
        w = jax.random.uniform(kw, (fan_in, fan_out), jnp.float32, -bound, bound)
        b = jax.random.uniform(kb, (1, fan_out), jnp.float32, -bound, bound)
        return w.astype(jnp.bfloat16), b

    w1, b1 = linear(keys[0], keys[1], state_dim, hidden)
    w2, b2 = linear(keys[2], keys[3], hidden, hidden)
    w3, b3 = linear(keys[4], keys[5], hidden, action_dim)
    return {"w1": w1, "b1": b1, "w2": w2, "b2": b2, "w3": w3, "b3": b3}


def actor_reference(state, params):
    # Mirrors the kernel's numerics: bf16 matmul operands, f32 accumulate,
    # f32 bias/relu/tanh.
    def dot32(a, w):
        return jnp.dot(a.astype(jnp.bfloat16), w, preferred_element_type=jnp.float32)

    h1 = jnp.maximum(dot32(state, params["w1"]) + params["b1"], 0.0)
    h2 = jnp.maximum(dot32(h1, params["w2"]) + params["b2"], 0.0)
    return jnp.tanh(dot32(h2, params["w3"]) + params["b3"])


if __name__ == "__main__":
    key = jax.random.PRNGKey(0)
    k_state, k_params = jax.random.split(key)

    batch = 2
    state_dim = 16
    action_dim = 4

    state = jax.random.normal(k_state, (batch, state_dim), jnp.float32)
    params = init_actor_params(k_params, state_dim, action_dim)

    action = actor_forward(state, params)
    action = jax.block_until_ready(action)

    expected = actor_reference(state, params)
    assert action.shape == (batch, action_dim)
    assert jnp.allclose(action, expected, atol=1e-3, rtol=1e-3), (
        jnp.max(jnp.abs(action - expected)))

    print("KERNEL_OK")
</pallas_src>

<mosaic_0001>
module attributes {stable_mosaic.version = 11 : i64} {
  func.func @actor_kernel(%arg0: i32, %arg1: memref<8x16xf32, #tpu.memory_space<vmem>>, %arg2: memref<16x128xbf16, #tpu.memory_space<vmem>>, %arg3: memref<1x128xf32, #tpu.memory_space<vmem>>, %arg4: memref<128x128xbf16, #tpu.memory_space<vmem>>, %arg5: memref<1x128xf32, #tpu.memory_space<vmem>>, %arg6: memref<128x4xbf16, #tpu.memory_space<vmem>>, %arg7: memref<1x4xf32, #tpu.memory_space<vmem>>, %arg8: memref<8x4xf32, #tpu.memory_space<vmem>>) attributes {dimension_semantics = [#tpu.dimension_semantics<parallel>], iteration_bounds = array<i64: 1>, scalar_prefetch = 0 : i64, scratch_operands = 0 : i64, tpu.core_type = #tpu.core_type<tc>, window_params = [{transform_indices = @transform_0, window_bounds = array<i64: 8, 16>}, {pipeline_mode = #tpu.pipeline_mode<synchronous>, transform_indices = @transform_1, window_bounds = array<i64: 16, 128>}, {pipeline_mode = #tpu.pipeline_mode<synchronous>, transform_indices = @transform_2, window_bounds = array<i64: 1, 128>}, {pipeline_mode = #tpu.pipeline_mode<synchronous>, transform_indices = @transform_3, window_bounds = array<i64: 128, 128>}, {pipeline_mode = #tpu.pipeline_mode<synchronous>, transform_indices = @transform_4, window_bounds = array<i64: 1, 128>}, {pipeline_mode = #tpu.pipeline_mode<synchronous>, transform_indices = @transform_5, window_bounds = array<i64: 128, 4>}, {pipeline_mode = #tpu.pipeline_mode<synchronous>, transform_indices = @transform_6, window_bounds = array<i64: 1, 4>}, {transform_indices = @transform_7, window_bounds = array<i64: 8, 4>}]} {
    %c0 = arith.constant 0 : index
    %c0_0 = arith.constant 0 : index
    %0 = vector.load %arg1[%c0, %c0_0] : memref<8x16xf32, #tpu.memory_space<vmem>>, vector<8x16xf32>
    %1 = arith.truncf %0 : vector<8x16xf32> to vector<8x16xbf16>
    %c0_1 = arith.constant 0 : index
    %c0_2 = arith.constant 0 : index
    %2 = vector.load %arg2[%c0_1, %c0_2] : memref<16x128xbf16, #tpu.memory_space<vmem>>, vector<16x128xbf16>
    %cst = arith.constant dense<0.000000e+00> : vector<8x128xf32>
    %3 = tpu.matmul %1, %2, %cst {dimension_numbers = #tpu.dot_dimension_numbers<[1], [0], [0], [1], [0, 0, 1, 1], [], []>} : vector<8x16xbf16>, vector<16x128xbf16>, vector<8x128xf32> -> vector<8x128xf32>
    %c0_3 = arith.constant 0 : index
    %c0_4 = arith.constant 0 : index
    %4 = vector.load %arg3[%c0_3, %c0_4] : memref<1x128xf32, #tpu.memory_space<vmem>>, vector<1x128xf32>
    %5 = vector.broadcast %4 : vector<1x128xf32> to vector<8x128xf32>
    %6 = arith.addf %3, %5 : vector<8x128xf32>
    %cst_5 = arith.constant 0.000000e+00 : f32
    %7 = vector.broadcast %cst_5 : f32 to vector<8x128xf32>
    %8 = arith.maximumf %6, %7 : vector<8x128xf32>
    %9 = arith.truncf %8 : vector<8x128xf32> to vector<8x128xbf16>
    %c0_6 = arith.constant 0 : index
    %c0_7 = arith.constant 0 : index
    %10 = vector.load %arg4[%c0_6, %c0_7] : memref<128x128xbf16, #tpu.memory_space<vmem>>, vector<128x128xbf16>
    %cst_8 = arith.constant dense<0.000000e+00> : vector<8x128xf32>
    %11 = tpu.matmul %9, %10, %cst_8 {dimension_numbers = #tpu.dot_dimension_numbers<[1], [0], [0], [1], [0, 0, 1, 1], [], []>} : vector<8x128xbf16>, vector<128x128xbf16>, vector<8x128xf32> -> vector<8x128xf32>
    %c0_9 = arith.constant 0 : index
    %c0_10 = arith.constant 0 : index
    %12 = vector.load %arg5[%c0_9, %c0_10] : memref<1x128xf32, #tpu.memory_space<vmem>>, vector<1x128xf32>
    %13 = vector.broadcast %12 : vector<1x128xf32> to vector<8x128xf32>
    %14 = arith.addf %11, %13 : vector<8x128xf32>
    %cst_11 = arith.constant 0.000000e+00 : f32
    %15 = vector.broadcast %cst_11 : f32 to vector<8x128xf32>
    %16 = arith.maximumf %14, %15 : vector<8x128xf32>
    %17 = arith.truncf %16 : vector<8x128xf32> to vector<8x128xbf16>
    %c0_12 = arith.constant 0 : index
    %c0_13 = arith.constant 0 : index
    %18 = vector.load %arg6[%c0_12, %c0_13] : memref<128x4xbf16, #tpu.memory_space<vmem>>, vector<128x4xbf16>
    %cst_14 = arith.constant dense<0.000000e+00> : vector<8x4xf32>
    %19 = tpu.matmul %17, %18, %cst_14 {dimension_numbers = #tpu.dot_dimension_numbers<[1], [0], [0], [1], [0, 0, 1, 1], [], []>} : vector<8x128xbf16>, vector<128x4xbf16>, vector<8x4xf32> -> vector<8x4xf32>
    %c0_15 = arith.constant 0 : index
    %c0_16 = arith.constant 0 : index
    %20 = vector.load %arg7[%c0_15, %c0_16] : memref<1x4xf32, #tpu.memory_space<vmem>>, vector<1x4xf32>
    %21 = vector.broadcast %20 : vector<1x4xf32> to vector<8x4xf32>
    %22 = arith.addf %19, %21 : vector<8x4xf32>
    %23 = math.tanh %22 : vector<8x4xf32>
    %c0_17 = arith.constant 0 : index
    %c0_18 = arith.constant 0 : index
    %24 = vector.load %arg8[%c0_17, %c0_18] : memref<8x4xf32, #tpu.memory_space<vmem>>, vector<8x4xf32>
    tpu.vector_store %arg8[%c0_17, %c0_18], %23 {strides = array<i32>} : memref<8x4xf32, #tpu.memory_space<vmem>>, vector<8x4xf32>,
    return
  }
  func.func @transform_0(%arg0: i32) -> (i32, i32) {
    %c0_i32 = arith.constant 0 : i32
    %c0_i32_0 = arith.constant 0 : i32
    return %arg0, %c0_i32 : i32, i32
  }
  func.func @transform_1(%arg0: i32) -> (i32, i32) {
    %c0_i32 = arith.constant 0 : i32
    %c0_i32_0 = arith.constant 0 : i32
    %c0_i32_1 = arith.constant 0 : i32
    return %c0_i32, %c0_i32_0 : i32, i32
  }
  func.func @transform_2(%arg0: i32) -> (i32, i32) {
    %c0_i32 = arith.constant 0 : i32
    %c0_i32_0 = arith.constant 0 : i32
    %c0_i32_1 = arith.constant 0 : i32
    return %c0_i32, %c0_i32_0 : i32, i32
  }
  func.func @transform_3(%arg0: i32) -> (i32, i32) {
    %c0_i32 = arith.constant 0 : i32
    %c0_i32_0 = arith.constant 0 : i32
    %c0_i32_1 = arith.constant 0 : i32
    return %c0_i32, %c0_i32_0 : i32, i32
  }
  func.func @transform_4(%arg0: i32) -> (i32, i32) {
    %c0_i32 = arith.constant 0 : i32
    %c0_i32_0 = arith.constant 0 : i32
    %c0_i32_1 = arith.constant 0 : i32
    return %c0_i32, %c0_i32_0 : i32, i32
  }
  func.func @transform_5(%arg0: i32) -> (i32, i32) {
    %c0_i32 = arith.constant 0 : i32
    %c0_i32_0 = arith.constant 0 : i32
    %c0_i32_1 = arith.constant 0 : i32
    return %c0_i32, %c0_i32_0 : i32, i32
  }
  func.func @transform_6(%arg0: i32) -> (i32, i32) {
    %c0_i32 = arith.constant 0 : i32
    %c0_i32_0 = arith.constant 0 : i32
    %c0_i32_1 = arith.constant 0 : i32
    return %c0_i32, %c0_i32_0 : i32, i32
  }
  func.func @transform_7(%arg0: i32) -> (i32, i32) {
    %c0_i32 = arith.constant 0 : i32
    %c0_i32_0 = arith.constant 0 : i32
    return %arg0, %c0_i32 : i32, i32
  }
}

</mosaic_0001>

<bundles_post_ra>
// kernel: tpu_custom_call.1
= control target key start
LH: loop header
LB: loop body
LE: loop exit
PB: predicated region body
PF: predicated region fallthrough
CT: control target
= control target key end

     0   :  { %12 = vsyncpa [#allocation3], 0  ;;  %s520_s0 = inlined_call_operand.hbm [shape: f32[8,16], index: 0, kind: input, shape index: {}]   ;;  %s521_s1 = inlined_call_operand.hbm [shape: bf16[16,128], index: 1, kind: input, shape index: {}]   ;;  %s522_s2 = inlined_call_operand.vmem [shape: f32[1,128], index: 2, kind: input, shape index: {}]   ;;  %s523_s3 = inlined_call_operand.vmem [shape: bf16[128,128], index: 3, kind: input, shape index: {}]   ;;  %s524_s4 = inlined_call_operand.vmem [shape: f32[1,128], index: 4, kind: input, shape index: {}]   ;;  %s525_s5 = inlined_call_operand.vmem [shape: bf16[128,4], index: 5, kind: input, shape index: {}]   ;;  %s526_s6 = inlined_call_operand.vmem [shape: f32[1,4], index: 6, kind: input, shape index: {}]   ;;  %s527_s7 = inlined_call_operand.vmem [shape: f32[8,4], index: 7, kind: output, shape index: {}]  }
   0x1   :  { %s19_s26 = sshll.u32 %s520_s0, 4  ;;  %s20_s26 = int_to_ptr.hbm [resolvable:$true] %s19_s26 }
   0x2   :  { %13 = vsyncpa [#allocation5], 0  ;;  %s410_s27 = smov [#allocation2]   ;;  %s29_s8 = sshll.u32 %s521_s1, 4  ;;  %s30_s8 = int_to_ptr.hbm [resolvable:$true] %s29_s8 }
   0x3   :  { %s21_s28 = sshll.u32 %s410_s27, 4  ;;  %s411_s9 = smov [#allocation4]   ;;  %s22_s28 = int_to_ptr.vmem [resolvable:$true] %s21_s28 }
   0x4   :  { %24 = dma.hbm_to_vmem [thread:$0]  %s20_s26, 128, %s22_s28, [#allocation3]  }
   0x5   :  { %s31_s10 = sshll.u32 %s411_s9, 4  ;;  %s412_s11 = smov 64   ;;  %s32_s10 = int_to_ptr.vmem [resolvable:$true] %s31_s10 }
   0x6   :  { %s413_s12 = smov 4  }
   0x7   :  { %37 = dma.hbm_to_vmem [thread:$0]  %s30_s8, 128, %s32_s10, [#allocation5], %s412_s11, %s412_s11, %s413_s12  }
   0x8   :  { %406 = dma.done.wait [#allocation3], 128  }
   0x9   :  { %407 = vsyncadd [#allocation3], 4294967168 }
   0xa   :  { %408 = dma.done.wait [#allocation5], 128  }
   0xb   :  { %409 = vsyncadd [#allocation5], 4294967168  ;;  %v332_v0 = vld [vmem:[#allocation4] sm:$0xff]  ;;  %v57_v1 = vld [vmem:[#allocation2] sm:$0xff]  ;;  %vm71_vm0 = vcmask 130048   ;;  %vm255_vm1 = vcmask 31744  }
   0xc   :  { %v340_v2 = vld [vmem:[%s523_s3 + $0x38] sm:$0xff]  ;;  %v58_v3 = vpack.c.bf16 %v57_v1, %v57_v1  ;;  %82 = vmatpush.bf16.msra.mxu0 %v332_v0  ;;  %v339_v4 = vld [vmem:[%s523_s3 + $0x30] sm:$0xff]  ;;  %v338_v5 = vld [vmem:[%s523_s3 + $0x28] sm:$0xff] }
   0xd   :  { %158 = vmatpush.bf16.msra.mxu1 %v340_v2  ;;  %v337_v6 = vld [vmem:[%s523_s3 + $0x20] sm:$0xff]  ;;  %v336_v7 = vld [vmem:[%s523_s3 + $0x18] sm:$0xff]  ;;  %v335_v8 = vld [vmem:[%s523_s3 + $0x10] sm:$0xff] }
   0xe   :  { %v334_v9 = vld [vmem:[%s523_s3 + $0x8] sm:$0xff]  ;;  %v333_v10 = vld [vmem:[%s523_s3] sm:$0xff]  ;;  %v348_v11 = vld [vmem:[%s525_s5 + $0x38] sm:$0xff] }
   0xf   :  { %267 = vmatmul.msk.bf16.vlgmr.msra.gmra.mxu0 %vm71_vm0, %v58_v3  ;;  %241 = vmatpush.bf16.msra.mxu2 %v348_v11  ;;  %v347_v12 = vld [vmem:[%s525_s5 + $0x30] sm:$0xff]  ;;  %v346_v13 = vld [vmem:[%s525_s5 + $0x28] sm:$0xff]  ;;  %v345_v14 = vld [vmem:[%s525_s5 + $0x20] sm:$0xff] }
  0x10   :  { %v344_v15 = vld [vmem:[%s525_s5 + $0x18] sm:$0xff]  ;;  %v343_v16 = vld [vmem:[%s525_s5 + $0x10] sm:$0xff]  ;;  %v353_v17 = vld [vmem:[%s522_s2] ss:$0 sm:$0xff] }
  0x11   :  { %159 = vmatpush.bf16.msra.mxu1 %v339_v4  ;;  %v342_v23 = vld [vmem:[%s525_s5 + $0x8] sm:$0xff]  ;;  %v341_v24 = vld [vmem:[%s525_s5] sm:$0xff] }
  0x12   :  { %v354_v25 = vld [vmem:[%s524_s4] ss:$0 sm:$0xff] }
  0x13   :  { %242 = vmatpush.bf16.msra.mxu2 %v347_v12  ;;  %v355_v31 = vld [vmem:[%s526_s6] ss:$0 sm:$0xff] }
  0x15   :  { %160 = vmatpush.bf16.msra.mxu1 %v338_v5 }
  0x17   :  { %243 = vmatpush.bf16.msra.mxu2 %v346_v13 }
  0x19   :  { %161 = vmatpush.bf16.msra.mxu1 %v337_v6 }
  0x1b   :  { %244 = vmatpush.bf16.msra.mxu2 %v345_v14 }
  0x1d   :  { %162 = vmatpush.bf16.msra.mxu1 %v336_v7 }
  0x1f   :  { %245 = vmatpush.bf16.msra.mxu2 %v344_v15 }
  0x21   :  { %163 = vmatpush.bf16.msra.mxu1 %v335_v8 }
  0x23   :  { %246 = vmatpush.bf16.msra.mxu2 %v343_v16 }
  0x25   :  { %164 = vmatpush.bf16.msra.mxu1 %v334_v9 }
  0x27   :  { %247 = vmatpush.bf16.msra.mxu2 %v342_v23 }
  0x29   :  { %165 = vmatpush.bf16.msra.mxu1 %v333_v10 }
  0x2b   :  { %248 = vmatpush.bf16.msra.mxu2 %v341_v24 }
  0x8c   :  { %v84_v18 = vpop.f32.mrf.mxu0 }
  0x8d   :  { %v85_v19 = vadd.f32 %v353_v17, %v84_v18 }
  0x8f   :  { %v88_v20 = vmax.f32 %v85_v19, 0.0 }
  0x91   :  { %v89_v21 = vpack.c.bf16 %v88_v20, %v88_v20 }
  0x93   :  { %166 = vmatmul.bf16.vlgmr.msra.gmra.mxu1 %v89_v21 }
  0x94   :  { %v86_v22 = vpop.f32.mrf.mxu0 }
 0x110   :  { %v167_v26 = vpop.f32.mrf.mxu1 }
 0x111   :  { %v168_v27 = vadd.f32 %v354_v25, %v167_v26 }
 0x113   :  { %v171_v28 = vmax.f32 %v168_v27, 0.0 }
 0x115   :  { %v172_v29 = vpack.c.bf16 %v171_v28, %v171_v28 }
 0x117   :  { %249 = vmatmul.bf16.vlgmr.msra.gmra.mxu2 %v172_v29 }
 0x118   :  { %v169_v30 = vpop.f32.mrf.mxu1 }
 0x19a   :  { %v250_v32 = vpop.f32.mrf.mxu2 }
 0x19b   :  { %v251_v33 = vadd.f32 %v355_v31, %v250_v32 }
 0x19d   :  { %356 = vtanh.f32 %v251_v33 }
 0x1a2   :  { %v252_v34 = vpop.f32.mrf.mxu2 }
 0x1a3   :  { %v357_v35 = vpop.eup %356 }
 0x1a4   :  { %256 = vst.msk [vmem:[%s527_s7] sm:$0xff] %vm255_vm1, %v357_v35 }
 0x1a5   :  { %261 = vsyncpa [#allocation3], 1 }
 0x1a6   :  { %262 = vsyncpa [#allocation5], 1 }

</bundles_post_ra>
